<compile_context>
chip_gen: v7x
topology: tpu7x:2x2x1
jax: 0.10.0
libtpu: 0.0.40
codegen_flags: <defaults>
</compile_context>

<pallas_src>
from functools import partial

import numpy as np
import jax
import jax.numpy as jnp
from jax import lax
from jax.experimental import pallas as pl
from jax.experimental.pallas import tpu as pltpu


def _round_up(x, m):
    return ((x + m - 1) // m) * m


def _proto_loss_kernel(n_classes, n_q_total,
                       support_ref, avg_ref, qT_ref, onehot_ref, tgt_ref,
                       out_ref, protos_ref, psq_ref, acc_ref):
    step = pl.program_id(0)

    # --- step 0: prototypes via a tiny MXU matmul, cached in VMEM scratch ---
    @pl.when(step == 0)
    def _():
        protos = jnp.dot(avg_ref[...], support_ref[...],
                         preferred_element_type=jnp.float32)            # (nc, Dp)
        protos_ref[...] = protos
        psq_ref[...] = jnp.sum(protos * protos, axis=1, keepdims=True)  # (nc, 1)
        acc_ref[0] = 0.0
        acc_ref[1] = 0.0

    protos = protos_ref[...]                                        # (nc, Dp)
    qT = qT_ref[...]                                                # (Dp, TQ)

    # logits = -||q - p||^2 = 2 p.q - ||q||^2 - ||p||^2
    # classes on sublanes, queries on lanes -> lane-dense, cheap axis-0 reduces.
    pq = jnp.dot(protos, qT, preferred_element_type=jnp.float32)    # (nc, TQ)
    q_sq = jnp.sum(qT * qT, axis=0, keepdims=True)                  # (1, TQ)
    logits = 2.0 * pq - q_sq - psq_ref[...]                         # (nc, TQ)

    # log-softmax over classes (axis 0)
    m = jnp.max(logits, axis=0, keepdims=True)                      # (1, TQ)
    lse = m + jnp.log(jnp.sum(jnp.exp(logits - m), axis=0, keepdims=True))
    log_p = logits - lse                                            # (nc, TQ)

    # loss: -sum of log_p at the target class (one-hot is a host-built constant;
    # padded query columns have an all-zero one-hot column -> contribute 0).
    loss_part = -jnp.sum(onehot_ref[...] * log_p)

    # accuracy: first-occurrence argmax over classes vs. target class id
    # (padded columns carry target id -1 and thus never count).
    row_idx = lax.broadcasted_iota(jnp.int32, logits.shape, 0)
    y_hat = jnp.min(jnp.where(logits == m, row_idx, n_classes),
                    axis=0, keepdims=True)                          # (1, TQ)
    correct_part = jnp.sum((y_hat == tgt_ref[...]).astype(jnp.float32))

    acc_ref[0] = acc_ref[0] + loss_part
    acc_ref[1] = acc_ref[1] + correct_part

    @pl.when(step == pl.num_programs(0) - 1)
    def _():
        inv = 1.0 / n_q_total
        out_ref[0, 0] = acc_ref[0] * inv
        out_ref[0, 1] = acc_ref[1] * inv


def _proto_loss_pallas(support, avg, qT, onehot, tgt_cls, *,
                       n_classes, n_query, dp, tq, nq_pad):
    n_q_total = n_classes * n_query
    ns_tot = support.shape[0]
    grid = (nq_pad // tq,)
    kernel = partial(_proto_loss_kernel, n_classes, n_q_total)

    out = pl.pallas_call(
        kernel,
        out_shape=jax.ShapeDtypeStruct((1, 2), jnp.float32),
        grid_spec=pltpu.PrefetchScalarGridSpec(
            num_scalar_prefetch=0,
            grid=grid,
            in_specs=[
                pl.BlockSpec((ns_tot, dp), lambda i: (0, 0)),         # support (flat, padded D)
                pl.BlockSpec((n_classes, ns_tot), lambda i: (0, 0)),  # averaging matrix
                pl.BlockSpec((dp, tq), lambda i: (0, i)),             # query^T tile (lanes = queries)
                pl.BlockSpec((n_classes, tq), lambda i: (0, i)),      # target one-hot tile
                pl.BlockSpec((1, tq), lambda i: (0, i)),              # target class ids tile
            ],
            out_specs=pl.BlockSpec((1, 2), lambda i: (0, 0),
                                   memory_space=pltpu.MemorySpace.SMEM),
            scratch_shapes=[
                pltpu.VMEM((n_classes, dp), jnp.float32),   # prototypes
                pltpu.VMEM((n_classes, 1), jnp.float32),    # ||p||^2
                pltpu.SMEM((2,), jnp.float32),              # loss-sum / correct-count
            ],
        ),
        compiler_params=pltpu.CompilerParams(
            dimension_semantics=("arbitrary",),
            vmem_limit_bytes=32 * 1024 * 1024,
        ),
    )(support, avg, qT, onehot, tgt_cls)
    return out[0, 0], out[0, 1]


@partial(jax.jit, static_argnames=("n_classes", "n_support", "n_query", "d"))
def _episode_forward(inp, supp_idx, query_idx, *, n_classes, n_support, n_query, d):
    dp = _round_up(d, 128)
    nq = n_classes * n_query
    tq = min(512, _round_up(nq, 128))
    nq_pad = _round_up(nq, tq)
    ns_tot = n_classes * n_support

    # device-side gather + zero-padding (lane-dense layouts for the kernel)
    support = jnp.take(inp, supp_idx, axis=0).astype(jnp.float32)      # (ns_tot, d)
    query = jnp.take(inp, query_idx, axis=0).astype(jnp.float32)       # (nq, d)
    support_p = jnp.zeros((ns_tot, dp), jnp.float32).at[:, :d].set(support)
    qT = jnp.zeros((dp, nq_pad), jnp.float32).at[:d, :nq].set(query.T)

    # compile-time constants (depend only on static episode structure)
    avg = np.zeros((n_classes, ns_tot), np.float32)
    for c in range(n_classes):
        avg[c, c * n_support:(c + 1) * n_support] = 1.0 / n_support
    tgt = np.repeat(np.arange(n_classes), n_query)
    onehot = np.zeros((n_classes, nq_pad), np.float32)
    onehot[tgt, np.arange(nq)] = 1.0
    tgt_cls = np.full((1, nq_pad), -1, np.int32)
    tgt_cls[0, :nq] = tgt

    return _proto_loss_pallas(
        support_p, jnp.asarray(avg), qT, jnp.asarray(onehot), jnp.asarray(tgt_cls),
        n_classes=n_classes, n_query=n_query, dp=dp, tq=tq, nq_pad=nq_pad)


def prototypical_loss(inp, target, n_support):
    """JAX/Pallas equivalent of the reference prototypical_loss(input, target, n_support)."""
    inp = jnp.asarray(inp)
    # TODO(synk): unique/nonzero have data-dependent shapes -> host-side glue;
    # in a training loop with fixed episode structure these indices can be
    # precomputed once and this host sync disappears.
    target_np = np.asarray(jax.device_get(target))

    classes = np.unique(target_np)                     # sorted, like torch.unique
    n_classes = int(classes.shape[0])
    n_query = int((target_np == classes[0]).sum()) - n_support
    d = int(inp.shape[-1])

    supp_idx = np.concatenate(
        [np.nonzero(target_np == c)[0][:n_support] for c in classes]).astype(np.int32)
    query_idx = np.concatenate(
        [np.nonzero(target_np == c)[0][n_support:] for c in classes]).astype(np.int32)

    return _episode_forward(inp, jnp.asarray(supp_idx), jnp.asarray(query_idx),
                            n_classes=n_classes, n_support=n_support,
                            n_query=n_query, d=d)


class PrototypicalLoss:
    """Mirror of the PyTorch Module; no learnable parameters."""

    def __init__(self, n_support):
        self.n_support = n_support

    def __call__(self, input, target):
        return prototypical_loss(input, target, self.n_support)


if __name__ == "__main__":
    key = jax.random.PRNGKey(0)
    n_classes, n_support, n_query, d = 4, 2, 3, 32
    n_total = n_classes * (n_support + n_query)        # 20 samples

    k1, k2 = jax.random.split(key)
    x = jax.random.normal(k1, (n_total, d), dtype=jnp.float32)
    base_labels = np.repeat(np.arange(n_classes), n_support + n_query)
    perm = np.asarray(jax.random.permutation(k2, n_total))
    target = jnp.asarray(base_labels[perm], dtype=jnp.int32)

    loss_fn = PrototypicalLoss(n_support)
    loss, acc = loss_fn(x, target)
    jax.block_until_ready((loss, acc))

    # pure numpy reference (mirrors the original torch implementation)
    x_np = np.asarray(x)
    t_np = np.asarray(target)
    classes = np.unique(t_np)
    supp_idx = np.concatenate([np.nonzero(t_np == c)[0][:n_support] for c in classes])
    query_idx = np.concatenate([np.nonzero(t_np == c)[0][n_support:] for c in classes])
    support_np = x_np[supp_idx].reshape(n_classes, n_support, d)
    query_np = x_np[query_idx]
    protos = support_np.mean(1)
    dists = ((query_np[:, None, :] - protos[None, :, :]) ** 2).sum(-1)
    logits = -dists
    mmax = logits.max(1, keepdims=True)
    logp = logits - (mmax + np.log(np.exp(logits - mmax).sum(1, keepdims=True)))
    tgt = np.repeat(np.arange(n_classes), n_query)
    loss_ref = -logp[np.arange(len(tgt)), tgt].mean()
    acc_ref = (np.argmax(logp, 1) == tgt).mean()

    assert abs(float(loss) - float(loss_ref)) < 1e-4, (float(loss), float(loss_ref))
    assert abs(float(acc) - float(acc_ref)) < 1e-6, (float(acc), float(acc_ref))
    print("KERNEL_OK")
</pallas_src>

<mosaic_0001>
module attributes {stable_mosaic.version = 11 : i64} {
  func.func @_proto_loss_kernel(%arg0: i32, %arg1: memref<8x128xf32, #tpu.memory_space<vmem>>, %arg2: memref<4x8xf32, #tpu.memory_space<vmem>>, %arg3: memref<128x128xf32, #tpu.memory_space<vmem>>, %arg4: memref<4x128xf32, #tpu.memory_space<vmem>>, %arg5: memref<1x128xi32, #tpu.memory_space<vmem>>, %arg6: memref<1x2xf32, #tpu.memory_space<smem>>, %arg7: memref<4x128xf32, #tpu.memory_space<vmem>>, %arg8: memref<4x1xf32, #tpu.memory_space<vmem>>, %arg9: memref<2xf32, #tpu.memory_space<smem>>) attributes {dimension_semantics = [#tpu.dimension_semantics<arbitrary>], iteration_bounds = array<i64: 1>, scalar_prefetch = 0 : i64, scratch_operands = 3 : i64, tpu.core_type = #tpu.core_type<tc>, window_params = [{pipeline_mode = #tpu.pipeline_mode<synchronous>, transform_indices = @transform_0, window_bounds = array<i64: 8, 128>}, {pipeline_mode = #tpu.pipeline_mode<synchronous>, transform_indices = @transform_1, window_bounds = array<i64: 4, 8>}, {transform_indices = @transform_2, window_bounds = array<i64: 128, 128>}, {transform_indices = @transform_3, window_bounds = array<i64: 4, 128>}, {transform_indices = @transform_4, window_bounds = array<i64: 1, 128>}, {transform_indices = @transform_5, window_bounds = array<i64: 1, 2>}]} {
    %c0_i32 = arith.constant 0 : i32
    %0 = arith.cmpi eq, %arg0, %c0_i32 : i32
    %1 = arith.extui %0 : i1 to i32
    %c0_i32_0 = arith.constant 0 : i32
    %2 = arith.cmpi ne, %1, %c0_i32_0 : i32
    scf.if %2 {
      %c0_23 = arith.constant 0 : index
      %c0_24 = arith.constant 0 : index
      %58 = vector.load %arg2[%c0_23, %c0_24] : memref<4x8xf32, #tpu.memory_space<vmem>>, vector<4x8xf32>
      %c0_25 = arith.constant 0 : index
      %c0_26 = arith.constant 0 : index
      %59 = vector.load %arg1[%c0_25, %c0_26] : memref<8x128xf32, #tpu.memory_space<vmem>>, vector<8x128xf32>
      %cst_27 = arith.constant dense<0.000000e+00> : vector<4x128xf32>
      %60 = tpu.matmul %58, %59, %cst_27 {dimension_numbers = #tpu.dot_dimension_numbers<[1], [0], [0], [1], [0, 0, 1, 1], [], []>} : vector<4x8xf32>, vector<8x128xf32>, vector<4x128xf32> -> vector<4x128xf32>
      %c0_28 = arith.constant 0 : index
      %c0_29 = arith.constant 0 : index
      %61 = vector.load %arg7[%c0_28, %c0_29] : memref<4x128xf32, #tpu.memory_space<vmem>>, vector<4x128xf32>
      tpu.vector_store %arg7[%c0_28, %c0_29], %60 {strides = array<i32>} : memref<4x128xf32, #tpu.memory_space<vmem>>, vector<4x128xf32>,
      %62 = arith.mulf %60, %60 : vector<4x128xf32>
      %cst_30 = arith.constant dense<0.000000e+00> : vector<4xf32>
      %63 = vector.multi_reduction <add>, %62, %cst_30 [1] : vector<4x128xf32> to vector<4xf32>
      %64 = vector.shape_cast %63 : vector<4xf32> to vector<4x1xf32>
      %c0_31 = arith.constant 0 : index
      %c0_32 = arith.constant 0 : index
      %65 = vector.load %arg8[%c0_31, %c0_32] : memref<4x1xf32, #tpu.memory_space<vmem>>, vector<4x1xf32>
      tpu.vector_store %arg8[%c0_31, %c0_32], %64 {strides = array<i32>} : memref<4x1xf32, #tpu.memory_space<vmem>>, vector<4x1xf32>,
      %cst_33 = arith.constant 0.000000e+00 : f32
      %c0_34 = arith.constant 0 : index
      %66 = memref.load %arg9[%c0_34] : memref<2xf32, #tpu.memory_space<smem>>
      memref.store %cst_33, %arg9[%c0_34] : memref<2xf32, #tpu.memory_space<smem>>
      %cst_35 = arith.constant 0.000000e+00 : f32
      %c1_36 = arith.constant 1 : index
      %67 = memref.load %arg9[%c1_36] : memref<2xf32, #tpu.memory_space<smem>>
      memref.store %cst_35, %arg9[%c1_36] : memref<2xf32, #tpu.memory_space<smem>>
    } else {
    }
    %c0 = arith.constant 0 : index
    %c0_1 = arith.constant 0 : index
    %3 = vector.load %arg7[%c0, %c0_1] : memref<4x128xf32, #tpu.memory_space<vmem>>, vector<4x128xf32>
    %c0_2 = arith.constant 0 : index
    %c0_3 = arith.constant 0 : index
    %4 = vector.load %arg3[%c0_2, %c0_3] : memref<128x128xf32, #tpu.memory_space<vmem>>, vector<128x128xf32>
    %cst = arith.constant dense<0.000000e+00> : vector<4x128xf32>
    %5 = tpu.matmul %3, %4, %cst {dimension_numbers = #tpu.dot_dimension_numbers<[1], [0], [0], [1], [0, 0, 1, 1], [], []>} : vector<4x128xf32>, vector<128x128xf32>, vector<4x128xf32> -> vector<4x128xf32>
    %6 = arith.mulf %4, %4 : vector<128x128xf32>
    %cst_4 = arith.constant dense<0.000000e+00> : vector<128xf32>
    %7 = vector.multi_reduction <add>, %6, %cst_4 [0] : vector<128x128xf32> to vector<128xf32>
    %8 = vector.shape_cast %7 : vector<128xf32> to vector<1x128xf32>
    %cst_5 = arith.constant 2.000000e+00 : f32
    %9 = vector.broadcast %cst_5 : f32 to vector<4x128xf32>
    %10 = arith.mulf %9, %5 : vector<4x128xf32>
    %11 = vector.broadcast %8 : vector<1x128xf32> to vector<4x128xf32>
    %12 = arith.subf %10, %11 : vector<4x128xf32>
    %c0_6 = arith.constant 0 : index
    %c0_7 = arith.constant 0 : index
    %13 = vector.load %arg8[%c0_6, %c0_7] : memref<4x1xf32, #tpu.memory_space<vmem>>, vector<4x1xf32>
    %14 = vector.broadcast %13 : vector<4x1xf32> to vector<4x128xf32>
    %15 = arith.subf %12, %14 : vector<4x128xf32>
    %cst_8 = arith.constant dense<0xFF800000> : vector<128xf32>
    %16 = vector.multi_reduction <maximumf>, %15, %cst_8 [0] : vector<4x128xf32> to vector<128xf32>
    %17 = vector.shape_cast %16 : vector<128xf32> to vector<1x128xf32>
    %18 = vector.broadcast %17 : vector<1x128xf32> to vector<4x128xf32>
    %19 = arith.subf %15, %18 : vector<4x128xf32>
    %20 = math.exp %19 : vector<4x128xf32>
    %cst_9 = arith.constant dense<0.000000e+00> : vector<128xf32>
    %21 = vector.multi_reduction <add>, %20, %cst_9 [0] : vector<4x128xf32> to vector<128xf32>
    %22 = vector.shape_cast %21 : vector<128xf32> to vector<1x128xf32>
    %23 = math.log %22 : vector<1x128xf32>
    %24 = arith.addf %17, %23 : vector<1x128xf32>
    %25 = vector.broadcast %24 : vector<1x128xf32> to vector<4x128xf32>
    %26 = arith.subf %15, %25 : vector<4x128xf32>
    %c0_10 = arith.constant 0 : index
    %c0_11 = arith.constant 0 : index
    %27 = vector.load %arg4[%c0_10, %c0_11] : memref<4x128xf32, #tpu.memory_space<vmem>>, vector<4x128xf32>
    %28 = arith.mulf %27, %26 : vector<4x128xf32>
    %29 = vector.shape_cast %28 : vector<4x128xf32> to vector<1x4x128xf32>
    %cst_12 = arith.constant dense<0.000000e+00> : vector<1xf32>
    %30 = vector.multi_reduction <add>, %29, %cst_12 [1, 2] : vector<1x4x128xf32> to vector<1xf32>
    %31 = vector.shape_cast %30 : vector<1xf32> to vector<1x1x1xf32>
    %32 = vector.extract %31[0, 0, 0] : f32 from vector<1x1x1xf32>
    %cst_13 = arith.constant 0.000000e+00 : f32
    %33 = arith.subf %cst_13, %32 : f32
    %34 = tpu.iota {dimensions = array<i32: 0>} : vector<4x128xi32>
    %35 = vector.broadcast %17 : vector<1x128xf32> to vector<4x128xf32>
    %36 = arith.cmpf oeq, %15, %35 : vector<4x128xf32>
    %c4_i32 = arith.constant 4 : i32
    %37 = vector.broadcast %c4_i32 : i32 to vector<4x128xi32>
    %38 = arith.select %36, %34, %37 : vector<4x128xi1>, vector<4x128xi32>
    %cst_14 = arith.constant dense<2147483647> : vector<128xi32>
    %39 = vector.multi_reduction <minsi>, %38, %cst_14 [0] : vector<4x128xi32> to vector<128xi32>
    %40 = vector.shape_cast %39 : vector<128xi32> to vector<1x128xi32>
    %c0_15 = arith.constant 0 : index
    %c0_16 = arith.constant 0 : index
    %41 = vector.load %arg5[%c0_15, %c0_16] : memref<1x128xi32, #tpu.memory_space<vmem>>, vector<1x128xi32>
    %42 = arith.cmpi eq, %40, %41 : vector<1x128xi32>
    %43 = arith.extui %42 : vector<1x128xi1> to vector<1x128xi32>
    %44 = arith.sitofp %43 : vector<1x128xi32> to vector<1x128xf32>
    %45 = vector.shape_cast %44 : vector<1x128xf32> to vector<1x1x128xf32>
    %cst_17 = arith.constant dense<0.000000e+00> : vector<1xf32>
    %46 = vector.multi_reduction <add>, %45, %cst_17 [1, 2] : vector<1x1x128xf32> to vector<1xf32>
    %47 = vector.shape_cast %46 : vector<1xf32> to vector<1x1x1xf32>
    %48 = vector.extract %47[0, 0, 0] : f32 from vector<1x1x1xf32>
    %c0_18 = arith.constant 0 : index
    %49 = memref.load %arg9[%c0_18] : memref<2xf32, #tpu.memory_space<smem>>
    %50 = arith.addf %49, %33 : f32
    %c0_19 = arith.constant 0 : index
    %51 = memref.load %arg9[%c0_19] : memref<2xf32, #tpu.memory_space<smem>>
    memref.store %50, %arg9[%c0_19] : memref<2xf32, #tpu.memory_space<smem>>
    %c1 = arith.constant 1 : index
    %52 = memref.load %arg9[%c1] : memref<2xf32, #tpu.memory_space<smem>>
    %53 = arith.addf %52, %48 : f32
    %c1_20 = arith.constant 1 : index
    %54 = memref.load %arg9[%c1_20] : memref<2xf32, #tpu.memory_space<smem>>
    memref.store %53, %arg9[%c1_20] : memref<2xf32, #tpu.memory_space<smem>>
    %c0_i32_21 = arith.constant 0 : i32
    %55 = arith.cmpi eq, %arg0, %c0_i32_21 : i32
    %56 = arith.extui %55 : i1 to i32
    %c0_i32_22 = arith.constant 0 : i32
    %57 = arith.cmpi ne, %56, %c0_i32_22 : i32
    scf.if %57 {
      %c0_23 = arith.constant 0 : index
      %58 = memref.load %arg9[%c0_23] : memref<2xf32, #tpu.memory_space<smem>>
      %cst_24 = arith.constant 0.0833333358 : f32
      %59 = arith.mulf %58, %cst_24 : f32
      %c0_25 = arith.constant 0 : index
      %c0_26 = arith.constant 0 : index
      %60 = memref.load %arg6[%c0_25, %c0_26] : memref<1x2xf32, #tpu.memory_space<smem>>
      memref.store %59, %arg6[%c0_25, %c0_26] : memref<1x2xf32, #tpu.memory_space<smem>>
      %c1_27 = arith.constant 1 : index
      %61 = memref.load %arg9[%c1_27] : memref<2xf32, #tpu.memory_space<smem>>
      %cst_28 = arith.constant 0.0833333358 : f32
      %62 = arith.mulf %61, %cst_28 : f32
      %c0_29 = arith.constant 0 : index
      %c1_30 = arith.constant 1 : index
      %63 = memref.load %arg6[%c0_29, %c1_30] : memref<1x2xf32, #tpu.memory_space<smem>>
      memref.store %62, %arg6[%c0_29, %c1_30] : memref<1x2xf32, #tpu.memory_space<smem>>
    } else {
    }
    return
  }
  func.func @transform_0(%arg0: i32) -> (i32, i32) {
    %c0_i32 = arith.constant 0 : i32
    %c0_i32_0 = arith.constant 0 : i32
    %c0_i32_1 = arith.constant 0 : i32
    return %c0_i32, %c0_i32_0 : i32, i32
  }
  func.func @transform_1(%arg0: i32) -> (i32, i32) {
    %c0_i32 = arith.constant 0 : i32
    %c0_i32_0 = arith.constant 0 : i32
    %c0_i32_1 = arith.constant 0 : i32
    return %c0_i32, %c0_i32_0 : i32, i32
  }
  func.func @transform_2(%arg0: i32) -> (i32, i32) {
    %c0_i32 = arith.constant 0 : i32
    %c0_i32_0 = arith.constant 0 : i32
    return %c0_i32, %arg0 : i32, i32
  }
  func.func @transform_3(%arg0: i32) -> (i32, i32) {
    %c0_i32 = arith.constant 0 : i32
    %c0_i32_0 = arith.constant 0 : i32
    return %c0_i32, %arg0 : i32, i32
  }
  func.func @transform_4(%arg0: i32) -> (i32, i32) {
    %c0_i32 = arith.constant 0 : i32
    %c0_i32_0 = arith.constant 0 : i32
    return %c0_i32, %arg0 : i32, i32
  }
  func.func @transform_5(%arg0: i32) -> (i32, i32) {
    %c0_i32 = arith.constant 0 : i32
    %c0_i32_0 = arith.constant 0 : i32
    %c0_i32_1 = arith.constant 0 : i32
    return %c0_i32, %c0_i32_0 : i32, i32
  }
}

</mosaic_0001>

<bundles_post_ra>
// kernel: _episode_forward.1
= control target key start
LH: loop header
LB: loop body
LE: loop exit
PB: predicated region body
PF: predicated region fallthrough
CT: control target
= control target key end

     0   :  { %vm27_vm0 = vcmask 64512   ;;  %v459_v2 = vmov 0.0   ;;  %vm460_vm1 = vmmov 0   ;;  %v461_v6 = vmov 0.0|0.0   ;;  %s568_s0 = inlined_call_operand.vmem [shape: f32[8,128], index: 0, kind: input, shape index: {}]   ;;  %s569_s1 = inlined_call_operand.vmem [shape: f32[4,8], index: 1, kind: input, shape index: {}]   ;;  %s570_s2 = inlined_call_operand.vmem [shape: f32[128,128], index: 2, kind: input, shape index: {}]   ;;  %s571_s3 = inlined_call_operand.vmem [shape: f32[4,128], index: 3, kind: input, shape index: {}]   ;;  %s572_s4 = inlined_call_operand.vmem [shape: s32[1,128], index: 4, kind: input, shape index: {}]   ;;  %s573_s5 = inlined_call_operand.vmem [shape: f32[1,2], index: 5, kind: output, shape index: {}]  }
   0x1   :  { %v26_v0 = vld [vmem:[%s568_s0] sm:$0xff]  ;;  %367 = vmatprep.subr.mxu0 %v459_v2  ;;  %369 = vmatprep.mubr.msk.f32.mxu0 %vm460_vm1, %v459_v2  ;;  %v115_v4 = vld [vmem:[%s570_s2 + $0x8] sm:$0xff]  ;;  %v116_v5 = vld [vmem:[%s570_s2 + $0x10] sm:$0xff] }
   0x2   :  { %v25_v1 = vld [vmem:[%s569_s1] sm:$0xf]  ;;  %368 = vmatpush3.msra.mxu0 %v26_v0  ;;  %407 = vmatprep.subr.bf16.mxu1 %v461_v6  ;;  %v201_v9 = vmul.f32 %v115_v4, %v115_v4  ;;  %v117_v10 = vld [vmem:[%s570_s2 + $0x18] sm:$0xff]  ;;  %v202_v11 = vmul.f32 %v116_v5, %v116_v5  ;;  %v119_v16 = vld [vmem:[%s570_s2 + $0x28] sm:$0xff] }
   0x3   :  { %v114_v3 = vld [vmem:[%s570_s2] sm:$0xff]  ;;  %370 = vmatmul.mubr.msk.f32.vlgmr.msra.gmra.mrb[0].mxu0 %vm27_vm0, %v25_v1  ;;  %v411_v13 = vpack.c.bf16 %v117_v10, %v116_v5  ;;  %v203_v14 = vmul.f32 %v117_v10, %v117_v10 }
   0x4   :  { %v408_v7 = vpack.c.bf16 %v115_v4, %v114_v3  ;;  %v200_v8 = vmul.f32 %v114_v3, %v114_v3  ;;  %v118_v15 = vld [vmem:[%s570_s2 + $0x20] sm:$0xff] }
   0x6   :  { %409 = vmatpush3.bf16.msra.mxu1 %v408_v7  ;;  %v216_v12 = vadd.f32 %v201_v9, %v200_v8 }
   0x7   :  { %410 = vmatprep.subr.bf16.mxu1 %v461_v6 }
   0x8   :  { %10 = vsyncpa [#allocation6], 0  ;;  %v217_v17 = vadd.f32 %v216_v12, %v202_v11  ;;  %v204_v18 = vmul.f32 %v118_v15, %v118_v15  ;;  %404 = vmatprep.mubr.msk.f32.mxu1 %vm460_vm1, %v459_v2  ;;  %v414_v20 = vpack.c.bf16 %v119_v16, %v118_v15  ;;  %v205_v21 = vmul.f32 %v119_v16, %v119_v16  ;;  %v120_v22 = vld [vmem:[%s570_s2 + $0x30] sm:$0xff]  ;;  %v121_v23 = vld [vmem:[%s570_s2 + $0x38] sm:$0xff]  ;;  %s335_s29 = sshll.u32 %s573_s5, 4  ;;  %s336_s29 = int_to_ptr.vmem [resolvable:$true] %s335_s29 }
   0x9   :  { %v206_v25 = vmul.f32 %v120_v22, %v120_v22  ;;  %v417_v27 = vpack.c.bf16 %v121_v23, %v120_v22  ;;  %v207_v28 = vmul.f32 %v121_v23, %v121_v23  ;;  %v122_v29 = vld [vmem:[%s570_s2 + $0x40] sm:$0xff]  ;;  %v123_v30 = vld [vmem:[%s570_s2 + $0x48] sm:$0xff]  ;;  %v124_v36 = vld [vmem:[%s570_s2 + $0x50] sm:$0xff]  ;;  %vm103_vm2 = vcmask 1043456   ;;  %s445_s9 = scalar_lea.vmem %s336_s29, 16  ;;  %p450_p1 = scmp.lt.s32.totalorder %s336_s29, %s336_s29 }
   0xa   :  { %412 = vmatpush3.bf16.msra.mxu1 %v411_v13  ;;  %v218_v19 = vadd.f32 %v217_v17, %v203_v14  ;;  %v208_v32 = vmul.f32 %v122_v29, %v122_v29  ;;  %v420_v34 = vpack.c.bf16 %v123_v30, %v122_v29  ;;  %v209_v35 = vmul.f32 %v123_v30, %v123_v30  ;;  %v125_v37 = vld [vmem:[%s570_s2 + $0x58] sm:$0xff]  ;;  %v126_v45 = vld [vmem:[%s570_s2 + $0x60] sm:$0xff]  ;;  %v127_v46 = vld [vmem:[%s570_s2 + $0x68] sm:$0xff]  ;;  %p446_p0 = scmp.ne.s32.totalorder %s336_s29, %s445_s9  ;;  %p451_p2 = scmp.lt.s32.totalorder %s445_s9, %s445_s9 }
   0xb   :  { %413 = vmatprep.subr.bf16.mxu1 %v461_v6  ;;  %v210_v39 = vmul.f32 %v124_v36, %v124_v36  ;;  %v423_v41 = vpack.c.bf16 %v125_v37, %v124_v36  ;;  %v211_v42 = vmul.f32 %v125_v37, %v125_v37  ;;  %v426_v47 = vpack.c.bf16 %v127_v46, %v126_v45  ;;  %v128_v51 = vld [vmem:[%s570_s2 + $0x70] sm:$0xff]  ;;  %v129_v52 = vld [vmem:[%s570_s2 + $0x78] sm:$0xff] }
   0xc   :  { %v219_v24 = vadd.f32 %v218_v19, %v204_v18  ;;  %v212_v48 = vmul.f32 %v126_v45, %v126_v45  ;;  %v213_v49 = vmul.f32 %v127_v46, %v127_v46  ;;  %v429_v53 = vpack.c.bf16 %v129_v52, %v128_v51  ;;  %v268_v45 = vld [vmem:[%s571_s3] sm:$0xf]  ;;  %p452_p3 = por %p451_p2, %p450_p1 }
   0xd   :  { %v214_v54 = vmul.f32 %v128_v51, %v128_v51  ;;  %v215_v56 = vmul.f32 %v129_v52, %v129_v52  ;;  %v462_v0 = vmov 0   ;;  %vm107_vm3 = vcmask 3072  }
   0xe   :  { %415 = vmatpush3.bf16.msra.mxu1 %v414_v20  ;;  %v220_v26 = vadd.f32 %v219_v24, %v205_v21  ;;  %440 = vset.pattern.permute.xlu0 %v462_v0  ;;  %v281_v24 = vlaneseq  ;;  %vm299_vm9 = vcmask 1040384   ;;  %p453_p4 = pnand %p452_p3, %p446_p0 }
   0xf   :  { %416 = vmatprep.subr.bf16.mxu1 %v461_v6 }
  0x10   :  { %v221_v31 = vadd.f32 %v220_v26, %v206_v25  ;;  %v282_v26 = vshrl.u32 %v281_v24, 7 }
  0x12   :  { %418 = vmatpush3.bf16.msra.mxu1 %v417_v27  ;;  %v222_v33 = vadd.f32 %v221_v31, %v207_v28 }
  0x13   :  { %419 = vmatprep.subr.bf16.mxu1 %v461_v6 }
  0x14   :  { %v223_v38 = vadd.f32 %v222_v33, %v208_v32 }
  0x16   :  { %421 = vmatpush3.bf16.msra.mxu1 %v420_v34  ;;  %v224_v40 = vadd.f32 %v223_v38, %v209_v35 }
  0x17   :  { %422 = vmatprep.subr.bf16.mxu1 %v461_v6 }
  0x18   :  { %v225_v43 = vadd.f32 %v224_v40, %v210_v39 }
  0x1a   :  { %424 = vmatpush3.bf16.msra.mxu1 %v423_v41  ;;  %v226_v44 = vadd.f32 %v225_v43, %v211_v42 }
  0x1b   :  { %425 = vmatprep.subr.bf16.mxu1 %v461_v6 }
  0x1c   :  { %v227_v50 = vadd.f32 %v226_v44, %v212_v48 }
  0x1e   :  { %427 = vmatpush3.bf16.msra.mxu1 %v426_v47  ;;  %v228_v55 = vadd.f32 %v227_v50, %v213_v49  ;;  %v295_v47 = vld [vmem:[%s572_s4] sm:$0x1] }
  0x1f   :  { %428 = vmatprep.subr.bf16.mxu1 %v461_v6 }
  0x20   :  { %v229_v57 = vadd.f32 %v228_v55, %v214_v54 }
  0x22   :  { %430 = vmatpush3.bf16.msra.mxu1 %v429_v53  ;;  %v230_v58 = vadd.f32 %v229_v57, %v215_v56 }
  0x24   :  { %v231_v4 = vrot.slane %v230_v58, 4 }
  0x26   :  { %v232_v5 = vadd.f32 %v231_v4, %v230_v58 }
  0x28   :  { %v233_v6 = vrot.slane %v232_v5, 2 }
  0x2a   :  { %v234_v7 = vadd.f32 %v233_v6, %v232_v5 }
  0x2c   :  { %v235_v8 = vrot.slane %v234_v7, 1 }
  0x2e   :  { %v236_v9 = vadd.f32 %v235_v8, %v234_v7 }
  0xd6   :  { %v97_v59 = vpop.f32.mrb[0].mxu0 }
  0xd7   :  { %101 = vst [vmem:[#allocation2] sm:$0xf] %v97_v59  ;;  %v371_v60 = vpop.f32.mrb[1].mxu0  ;;  %v102_v61 = vmul.f32 %v97_v59, %v97_v59 }
  0xd9   :  { %v104_v62 = vsel %vm103_vm2, %v102_v61, 0.0 }
  0xda   :  { %105 = vadd.xlane.f32.xlu0 %v104_v62 }
  0xde   :  { %v113_v63 = vld [vmem:[#allocation2] sm:$0xf] }
  0xdf   :  { %405 = vmatmul.mubr.f32.vlgmr.msra.gmra.mrb[0].mxu1 %v113_v63 }
 0x167   :  { %v106_v1 = vpop.xlane.xlu0 %105 }
 0x168   :  { %108 = vst.msk [vmem:[#allocation3] sm:$0xf] %vm107_vm3, %v106_v1 }
 0x16f   :  { %v239_v3 = vld [vmem:[#allocation3] sm:$0xf] }
 0x170   :  { %242 = vperm.xlu0 %440, %v239_v3  }
 0x1b2   :  { %v196_v10 = vpop.f32.mrb[0].mxu1 }
 0x1b3   :  { %v237_v11 = vmul.f32 2.0, %v196_v10  ;;  %v406_v12 = vpop.f32.mrb[1].mxu1 }
 0x1b5   :  { %v238_v13 = vsub.f32 %v237_v11, %v236_v9 }
 0x1ef   :  { %v243_v14 = vpop.permute.xlu0 %242 }
 0x1f0   :  { %v245_v15 = vsub.f32 %v238_v13, %v243_v14 }
 0x1f2   :  { %v247_v16 = vsel %vm103_vm2, %v245_v15, -inf }
 0x1f3   :  { %v248_v17 = vrot.slane %v247_v16, 4 }
 0x1f5   :  { %v249_v18 = vmax.f32 %v247_v16, %v248_v17 }
 0x1f7   :  { %v250_v19 = vrot.slane %v249_v18, 2 }
 0x1f9   :  { %v251_v20 = vmax.f32 %v249_v18, %v250_v19 }
 0x1fb   :  { %v252_v21 = vrot.slane %v251_v20, 1 }
 0x1fd   :  { %v253_v22 = vmax.f32 %v251_v20, %v252_v21 }
 0x1ff   :  { %v254_v23 = vsub.f32 %v245_v15, %v253_v22  ;;  %vm283_vm4 = vcmp.eq.f32.partialorder %v245_v15, %v253_v22 }
 0x200   :  { %v284_v27 = vsel %vm283_vm4, %v282_v26, 4 }
 0x201   :  { %v255_v25 = vmul.f32 1.442695, %v254_v23  ;;  %v285_v28 = vsel %vm103_vm2, %v284_v27, 2147483647 }
 0x202   :  { %v286_v31 = vrot.slane %v285_v28, 4 }
 0x203   :  { %441 = vpow2.f32 %v255_v25 }
 0x204   :  { %vm287_vm5 = vcmp.lt.s32.totalorder %v285_v28, %v286_v31 }
 0x205   :  { %v288_v36 = vsel %vm287_vm5, %v285_v28, %v286_v31 }
 0x206   :  { %v289_v38 = vrot.slane %v288_v36, 2 }
 0x208   :  { %vm290_vm6 = vcmp.lt.s32.totalorder %v288_v36, %v289_v38 }
 0x209   :  { %v291_v40 = vsel %vm290_vm6, %v288_v36, %v289_v38 }
 0x20a   :  { %v292_v41 = vrot.slane %v291_v40, 1 }
 0x20c   :  { %vm293_vm7 = vcmp.lt.s32.totalorder %v291_v40, %v292_v41 }
 0x20d   :  { %v442_v29 = vpop.eup %441  ;;  %v294_v46 = vsel %vm293_vm7, %v291_v40, %v292_v41 }
 0x20e   :  { %v257_v30 = vsel %vm103_vm2, %v442_v29, 0.0  ;;  %vm296_vm8 = vcmp.eq.s32.totalorder %v294_v46, %v295_v47 }
 0x20f   :  { %v258_v32 = vrot.slane %v257_v30, 4  ;;  %v345_v51 = vsel %vm296_vm8, 1.0, %v459_v2 }
 0x210   :  { %v300_v52 = vsel %vm299_vm9, %v345_v51, 0.0 }
 0x211   :  { %v259_v33 = vadd.f32 %v258_v32, %v257_v30 }
 0x213   :  { %v260_v34 = vrot.slane %v259_v33, 2 }
 0x215   :  { %v261_v35 = vadd.f32 %v260_v34, %v259_v33 }
 0x217   :  { %v262_v37 = vrot.slane %v261_v35, 1 }
 0x219   :  { %v263_v39 = vadd.f32 %v262_v37, %v261_v35 }
 0x21b   :  { %443 = vlog2.f32 %v263_v39 }
 0x225   :  { %v444_v42 = vpop.eup %443 }
 0x226   :  { %v265_v43 = vmul.f32 0.6931472, %v444_v42 }
 0x228   :  { %v266_v44 = vadd.f32 %v265_v43, %v253_v22 }
 0x22a   :  { %v267_v48 = vsub.f32 %v245_v15, %v266_v44 }
 0x22c   :  { %v269_v49 = vmul.f32 %v268_v45, %v267_v48 }
 0x22e   :  { %v270_v50 = vsel %vm103_vm2, %v269_v49, 0.0 }
 0x22f   :  { %271 = vadd.xlane.f32.xlu1 %v270_v50 }
 0x233   :  { %301 = vadd.xlane.f32.xlu1 %v300_v52 }
 0x2bc   :  { %v272_v53 = vpop.xlane.xlu1 %271 }
 0x2bd   :  { %v273_v54 = vrot.slane %v272_v53, 4 }
 0x2bf   :  { %v274_v55 = vadd.f32 %v273_v54, %v272_v53 }
 0x2c0   :  { %v302_v56 = vpop.xlane.xlu1 %301 }
 0x2c1   :  { %v275_v57 = vrot.slane %v274_v55, 2  ;;  %v303_v58 = vrot.slane %v302_v56, 4 }
 0x2c3   :  { %v304_v59 = vadd.f32 %v303_v58, %v302_v56  ;;  %v276_v60 = vadd.f32 %v275_v57, %v274_v55 }
 0x2c5   :  { %v305_v61 = vrot.slane %v304_v59, 2  ;;  %v277_v62 = vrot.slane %v276_v60, 1 }
 0x2c7   :  { %v306_v63 = vadd.f32 %v305_v61, %v304_v59  ;;  %v278_v0 = vadd.f32 %v277_v62, %v276_v60 }
 0x2c9   :  { %431 = vpush %v278_v0  ;;  %v307_v1 = vrot.slane %v306_v63, 1 }
 0x2cb   :  { %v308_v3 = vadd.f32 %v307_v1, %v306_v63 }
 0x2cd   :  { %433 = vpush %v308_v3 }
 0x2fa   :  { %s432_s3 = spop %431 }
 0x2fb   :  { %s280_s30 = ssub.f32 0.0, %s432_s3 }
 0x2fd   :  { %s322_s6 = smul.f32 0.083333336, %s280_s30 }
 0x2fe   :  { %s434_s7 = spop %433 }
 0x2ff   :  { %324 = sst [smem:[#allocation5]] %s322_s6  ;;  %s326_s8 = smul.f32 0.083333336, %s434_s7 }
 0x301   :  { %328 = sst [smem:[#allocation5 + $0x1]] %s326_s8 }
 0x302   :  { %456 = shalt.err (!%p453_p4)
}
 0x303   :  { %s463_s10 = smov [#allocation5]  }
 0x304   :  { %338 = dma.smem_to_vmem %s463_s10, 16, %s336_s29, [#allocation6]  }
 0x305   :  { %457 = dma.done.wait [#allocation6], 16  }
 0x306   :  { %458 = vsyncadd [#allocation6], 4294967280 }
 0x307   :  { %342 = sfence }
 0x308   :  { %343 = vsyncpa [#allocation6], 1 }

</bundles_post_ra>
